<compile_context>
chip_gen: v5e
topology: v5e:2x2
jax: 0.10.0
libtpu: 0.0.40
codegen_flags: <defaults>
</compile_context>

<pallas_src>
import math

import jax
import jax.numpy as jnp
from jax.experimental import pallas as pl
from jax.experimental.pallas import tpu as pltpu


def make_positional_encoding(d_model: int, max_len: int, dtype=jnp.float32) -> jnp.ndarray:
    """Deterministic buffer identical to the PyTorch __init__: shape (1, max_len, d_model).

    Pass dtype=jnp.bfloat16 here (one-time, at init) if you want a narrower pe
    HBM read; the kernel still accumulates the add in f32.
    """
    position = jnp.arange(0, max_len, dtype=jnp.float32)[:, None]            # (L, 1)
    div_term = jnp.exp(
        jnp.arange(0, d_model, 2, dtype=jnp.float32) * (-math.log(10000.0) / d_model)
    )                                                                        # (D/2,)
    angles = position * div_term                                             # (L, D/2)
    pe = jnp.zeros((max_len, d_model), dtype=jnp.float32)
    pe = pe.at[:, 0::2].set(jnp.sin(angles))
    pe = pe.at[:, 1::2].set(jnp.cos(angles))
    return pe[None, :, :].astype(dtype)                                      # (1, L, D)


def _add_pe_kernel(x_ref, pe_ref, o_ref):
    # x_ref / o_ref: (1, TS, C) tile of one batch element; pe_ref: (1, TS, C)
    # tile shared across the batch.  Upcast -> f32 add -> single rounding on
    # the store: matches torch's `x + pe_fp32` promotion for low-precision x.
    x = x_ref[...].astype(jnp.float32)
    p = pe_ref[...].astype(jnp.float32)
    o_ref[...] = (x + p).astype(o_ref.dtype)


def _tpu_block_params():
    """(target bytes per operand block, is_two_tensorcore_chip)."""
    try:
        vmem_cap = pltpu.get_tpu_info().vmem_capacity_bytes
    except Exception:
        vmem_cap = 128 << 20  # v5e/v6e-like default
    two_tc = vmem_cap <= (64 << 20)          # v7x-class: 64 MiB VMEM, 2 TCs, ~3.2 TB/s HBM
    target_block_bytes = (4 << 20) if two_tc else (2 << 20)
    return target_block_bytes, two_tc


def positional_encoding_forward(x: jnp.ndarray, pe: jnp.ndarray, *, donate_x: bool = False) -> jnp.ndarray:
    """out = x + pe[:, :x.shape[1], :]   (x: (B, S, D), pe: (1, max_len, D))."""
    B, S, D = x.shape
    _, max_len, D_pe = pe.shape
    assert D_pe == D and S <= max_len

    out_dtype = jnp.promote_types(x.dtype, pe.dtype)

    # Pick a lane-dense 3-D view (B, L, C) of the (seq, d_model) plane.
    if D % 128 == 0:
        # Typical transformer case: D already lane-aligned, no reshape needed.
        C, L, Lpe = D, S, max_len
        x3, pe3 = x, pe
    elif (S * D) % 128 == 0 and (max_len * D) % 128 == 0:
        # Small d_model: merge (seq, d_model) and re-split on 128 lanes so the
        # store path uses full-width vst.  Row-major flattening of pe[:, :S, :]
        # is a prefix of the flattening of pe, so block index t addresses the
        # same elements in both views (no slice copy of pe).
        C = 128
        L, Lpe = (S * D) // C, (max_len * D) // C
        x3 = x.reshape(B, L, C)
        pe3 = pe.reshape(1, Lpe, C)
    else:
        # TODO(synk): pad d_model to a multiple of 128 at the model level so
        # production configs never hit this masked-store (vst.msk) fallback.
        C, L, Lpe = D, S, max_len
        x3, pe3 = x, pe

    x_item = jnp.dtype(x.dtype).itemsize
    pe_item = jnp.dtype(pe.dtype).itemsize
    out_item = jnp.dtype(out_dtype).itemsize

    target_block_bytes, two_tc = _tpu_block_params()

    # Tile the row axis: multiple-of-sublane rows, ~target_block_bytes per
    # operand block so 3 operands x 2 pipeline buffers stays well inside the
    # per-generation VMEM budget while each grid step moves enough bytes to
    # amortize the ~0.35us step overhead.
    sub = {4: 8, 2: 16, 1: 32}.get(x_item, 8)
    target_rows = max(sub, target_block_bytes // max(1, C * x_item))
    ts = (min(L, target_rows) // sub) * sub
    if ts == 0:
        # Degenerate tiny input (< one sublane tile of rows): use one full
        # block and slice pe so every block shape equals its array dims.
        ts = L
        pe3 = pe3[:, :L, :]
        Lpe = L
    num_tiles = pl.cdiv(L, ts)

    # v7x megacore: make sure each of the 2 TensorCores gets >= ~4 pipeline
    # steps before keeping the largest block (otherwise DMA latency is exposed).
    if two_tc and ts >= sub:
        while num_tiles * B < 8:
            new_ts = ((ts // 2) // sub) * sub
            if new_ts < sub or new_ts * C * x_item < (512 << 10):
                break
            ts = new_ts
            num_tiles = pl.cdiv(L, ts)

    # Explicit VMEM budget: double-buffered need for x / pe / out blocks, with
    # 2x headroom, capped at 40 MiB (safe under v7x's 64 MiB physical VMEM and
    # trivially under v5e/v6e's 128 MiB).
    block_elems = ts * C
    vmem_need = 2 * block_elems * (x_item + pe_item + out_item)
    vmem_limit = int(min(40 << 20, max(16 << 20, 2 * vmem_need)))

    # Aliasing is only legal when out and x have identical shape/dtype and the
    # caller actually donates x.
    io_aliases = {0: 0} if (donate_x and out_dtype == x.dtype) else {}

    cost = pl.CostEstimate(
        flops=int(B * S * D),
        transcendentals=0,
        bytes_accessed=int(B * S * D * x_item + S * D * pe_item + B * S * D * out_item),
    )

    out3 = pl.pallas_call(
        _add_pe_kernel,
        out_shape=jax.ShapeDtypeStruct((B, L, C), out_dtype),
        grid_spec=pltpu.PrefetchScalarGridSpec(
            num_scalar_prefetch=0,
            # Batch innermost: pe's block index is constant across it, so the
            # pipeline elides the repeated pe DMAs (pe read ~once total).
            grid=(num_tiles, B),
            in_specs=[
                pl.BlockSpec((1, ts, C), lambda t, b: (b, t, 0)),   # x tile
                pl.BlockSpec((1, ts, C), lambda t, b: (0, t, 0)),   # pe windowed from full buffer
            ],
            out_specs=pl.BlockSpec((1, ts, C), lambda t, b: (b, t, 0)),
        ),
        compiler_params=pltpu.CompilerParams(
            dimension_semantics=("parallel", "parallel"),  # megacore-shardable on v7x
            vmem_limit_bytes=vmem_limit,
        ),
        cost_estimate=cost,
        input_output_aliases=io_aliases,
    )(x3, pe3)

    return out3.reshape(B, S, D)


def _check(B, S, D, MAX_LEN, key):
    x = jax.random.normal(key, (B, S, D), dtype=jnp.float32)
    pe = make_positional_encoding(D, MAX_LEN)
    out = jax.block_until_ready(positional_encoding_forward(x, pe))
    ref = x + pe[:, :S, :]
    assert out.shape == (B, S, D)
    assert out.dtype == ref.dtype
    assert jnp.allclose(out, ref, atol=1e-6, rtol=1e-6), f"mismatch for {(B, S, D, MAX_LEN)}"


if __name__ == "__main__":
    key = jax.random.PRNGKey(0)
    k1, k2, k3 = jax.random.split(key, 3)

    # Main small config (d_model < 128 -> lane-dense view, pe windowed from a
    # larger max_len buffer with no slice copy).
    _check(B=2, S=32, D=32, MAX_LEN=64, key=k1)
    # Lane-aligned d_model path (the realistic transformer layout).
    _check(B=2, S=8, D=128, MAX_LEN=16, key=k2)
    # Tiny degenerate shape (original demo shape), exercises the fallback block.
    _check(B=2, S=8, D=32, MAX_LEN=16, key=k3)

    print("KERNEL_OK")
</pallas_src>

<mosaic_0001>
module attributes {stable_mosaic.version = 11 : i64} {
  func.func @_add_pe_kernel(%arg0: i32, %arg1: i32, %arg2: memref<1x8x128xf32, #tpu.memory_space<vmem>>, %arg3: memref<1x8x128xf32, #tpu.memory_space<vmem>>, %arg4: memref<1x8x128xf32, #tpu.memory_space<vmem>>) attributes {dimension_semantics = [#tpu.dimension_semantics<parallel>, #tpu.dimension_semantics<parallel>], iteration_bounds = array<i64: 1, 2>, scalar_prefetch = 0 : i64, scratch_operands = 0 : i64, tpu.core_type = #tpu.core_type<tc>, window_params = [{transform_indices = @transform_0, window_bounds = array<i64: 1, 8, 128>}, {transform_indices = @transform_1, window_bounds = array<i64: 1, 8, 128>}, {transform_indices = @transform_2, window_bounds = array<i64: 1, 8, 128>}]} {
    %c0 = arith.constant 0 : index
    %c0_0 = arith.constant 0 : index
    %c0_1 = arith.constant 0 : index
    %0 = vector.load %arg2[%c0, %c0_0, %c0_1] : memref<1x8x128xf32, #tpu.memory_space<vmem>>, vector<1x8x128xf32>
    %c0_2 = arith.constant 0 : index
    %c0_3 = arith.constant 0 : index
    %c0_4 = arith.constant 0 : index
    %1 = vector.load %arg3[%c0_2, %c0_3, %c0_4] : memref<1x8x128xf32, #tpu.memory_space<vmem>>, vector<1x8x128xf32>
    %2 = arith.addf %0, %1 : vector<1x8x128xf32>
    %c0_5 = arith.constant 0 : index
    %c0_6 = arith.constant 0 : index
    %c0_7 = arith.constant 0 : index
    %3 = vector.load %arg4[%c0_5, %c0_6, %c0_7] : memref<1x8x128xf32, #tpu.memory_space<vmem>>, vector<1x8x128xf32>
    tpu.vector_store %arg4[%c0_5, %c0_6, %c0_7], %2 {strides = array<i32>} : memref<1x8x128xf32, #tpu.memory_space<vmem>>, vector<1x8x128xf32>,
    return
  }
  func.func @transform_0(%arg0: i32, %arg1: i32) -> (i32, i32, i32) {
    %c0_i32 = arith.constant 0 : i32
    %c0_i32_0 = arith.constant 0 : i32
    return %arg1, %arg0, %c0_i32 : i32, i32, i32
  }
  func.func @transform_1(%arg0: i32, %arg1: i32) -> (i32, i32, i32) {
    %c0_i32 = arith.constant 0 : i32
    %c0_i32_0 = arith.constant 0 : i32
    %c0_i32_1 = arith.constant 0 : i32
    return %c0_i32, %arg0, %c0_i32_0 : i32, i32, i32
  }
  func.func @transform_2(%arg0: i32, %arg1: i32) -> (i32, i32, i32) {
    %c0_i32 = arith.constant 0 : i32
    %c0_i32_0 = arith.constant 0 : i32
    return %arg1, %arg0, %c0_i32 : i32, i32, i32
  }
}

</mosaic_0001>

<bundles_post_ra>
// kernel: tpu_custom_call.1
= control target key start
LH: loop header
LB: loop body
LE: loop exit
PB: predicated region body
PF: predicated region fallthrough
CT: control target
= control target key end

     0   :  { %7 = vsyncpa [#allocation3], 0  ;;  %s714_s0 = inlined_call_operand.hbm [shape: f32[2,8,128], index: 0, kind: input, shape index: {}]   ;;  %s715_s1 = inlined_call_operand.hbm [shape: f32[1,16,128], index: 1, kind: input, shape index: {}]   ;;  %s716_s2 = inlined_call_operand.hbm [shape: f32[2,8,128], index: 2, kind: output, shape index: {}]  }
   0x1   :  { %9 = vsyncpa [#allocation3 + $0x1], 0 }
   0x2   :  { %10 = vsyncpa [#allocation6], 0 }
   0x3   :  { %11 = vsyncpa [#allocation4], 0 }
   0x4   :  { %13 = vsyncpa [#allocation4 + $0x1], 0  ;;  %s565_s9 = smov 0   ;;  %s567_s10 = smov 0  }
   0x5   :  { %s569_s11 = smov 0   ;;  %s571_s12 = smov 0  }
   0x6   :  { %s573_s13 = smov 0   ;;  %s575_s14 = smov 0  }
   0x7 LB: > { %s313_s15 = sadd.s32 4294967295, %s547_s14   ;;  %s314_s16 = sadd.s32 4294967294, %s547_s14   ;;  %s547_s14 = sphi %s575_s14, %s19_s14   ;;  %s543_s13 = sphi %s573_s13, %s728_s13   ;;  %s539_s12 = sphi %s571_s12, %s727_s12   ;;  %s535_s11 = sphi %s569_s11, %s726_s11   ;;  %s531_s10 = sphi %s567_s10, %s725_s10   ;;  %s527_s9 = sphi %s565_s9, %s724_s9  }
   0x8   : > { %p53_p0 = scmp.ne.s32.totalorder %s531_s10, %s527_s9  ;;  %p599_p1 = scmp.eq.s32.totalorder %s313_s15, 0 }
   0x9   : > { %p603_p2 = scmp.eq.s32.totalorder %s313_s15, 1  ;;  %p111_p3 = scmp.eq.s32.totalorder %s314_s16, 1 }
   0xa   : > { %p609_p4 = por %p599_p1, %p53_p0  ;;  %p315_p5 = scmp.ge.s32.totalorder %s547_s14, 1 }
   0xb   : > { %p614_p6 = por %p111_p3, %p53_p0  ;;  %p118_p7 = scmp.lt.s32.totalorder %s547_s14, 3 }
   0xc   : > { %s132_s23 = sshll.u32 %s715_s1, 4  ;;  %p317_p9 = scmp.ge.s32.totalorder %s547_s14, 2  ;;  %s133_s23 = int_to_ptr.hbm [resolvable:$true] %s132_s23 }
   0xd   : > { %p622_p8 = pnand %p315_p5, %p118_p7  ;;  %s549_s25 = smov [#allocation5]  }
   0xe   : > { %s134_s26 = sshll.u32 %s549_s25, 4  ;;  %s28_s27 = sadd.s32 1, %s543_s13  ;;  %s135_s26 = int_to_ptr.vmem [resolvable:$true] %s134_s26 }
   0xf   : > { %p336_p10 = pneg %p622_p8  ;;  %p29_p12 = scmp.ge.s32.totalorder %s28_s27, 2 }
  0x10   : > { %s40_s28 = sadd.s32 1, %s535_s11  ;;  %p47_p13 = scmp.ne.s32.totalorder %s535_s11, %s531_s10 }
  0x11   : > { %p337_p11 = pnand %p336_p10, %p599_p1  ;;  %p48_p0 = scmp.eq.s32.totalorder %s547_s14, 0 }
  0x12   : > { %s730_s27 = smov (%p29_p12, %s28_s27), 0  ;;  %p644_p5 = por %p603_p2, %p47_p13 }
  0x13   : > { %339 = dma.hbm_to_vmem [thread:$0]  (!%p337_p11), %s133_s23, 128, %s135_s26, [#allocation6]  }
  0x14   : > { %p638_p3 = por %p48_p0, %p47_p13  ;;  %s35_s3 = ssub.s32 %s543_s13, %s730_s27 }
  0x15   : > { %p349_p7 = scmp.lt.s32.totalorder %s547_s14, 2  ;;  %p38_p10 = scmp.eq.s32.totalorder %s35_s3, 0 }
  0x16   : > { %s145_s4 = sand.u32 1, %s535_s11   ;;  %s319_s7 = sshll.u32 %s543_s13, 3 }
  0x17   : > { %s318_s5 = sshll.u32 %s145_s4, 3  ;;  %s154_s16 = scalar_lea.hbm %s714_s0, %s319_s7 }
  0x18   : > { %s653_s6 = scalar_select %p38_p10, %s535_s11, %s40_s28  }
  0x19   : > { %s149_s21 = scalar_lea.vmem [#allocation2], %s318_s5  ;;  %s156_s18 = sshll.u32 %s154_s16, 4  ;;  %s157_s18 = int_to_ptr.hbm [resolvable:$true] %s156_s18 }
  0x1a   : > { %s158_s22 = sshll.u32 %s149_s21, 4  ;;  %p341_p2 = pnand %p349_p7, %p638_p3  ;;  %s159_s22 = int_to_ptr.vmem [resolvable:$true] %s158_s22 }
  0x1b   : > { %s146_s23 = scalar_lea.sflag [#allocation3], %s145_s4  ;;  %167 = sbr.rel (%p622_p8) target bundleno = 50 (0x32), region = 28 }
  0x1c   : > { %343 = dma.hbm_to_vmem [thread:$0]  (!%p341_p2), %s157_s18, 128, %s159_s22, %s146_s23  }
  0x1d   : > { %s664_s25 = sand.u32 (!%p622_p8), 1, %s531_s10  }
  0x1e   : > { %s321_s26 = sshll.u32 (!%p622_p8), %s664_s25, 3  ;;  %s170_s28 = scalar_lea.sflag (!%p622_p8), [#allocation3], %s664_s25 }
  0x1f   : > { %s173_s3 = scalar_lea.vmem (!%p622_p8), [#allocation2], %s321_s26 }
  0x20   : > { %514 = dma.done.wait (%p609_p4), %s170_s28, 128  }
  0x21   : > { %516 = vsyncadd (%p609_p4), %s170_s28, 4294967168 }
  0x22   : > { %518 = dma.done.wait (%p599_p1), [#allocation6], 128  }
  0x23   : > { %520 = vsyncadd (%p599_p1), [#allocation6], 4294967168  ;;  %s325_s24 = sshll.u32 %s539_s12, 3  ;;  %s199_s7 = scalar_lea.vmem [#allocation7], %s321_s26  ;;  %v200_v0 = vld [vmem:[%s173_s3] sm:$0xff]  ;;  %v201_v1 = vld [vmem:[#allocation5] sm:$0xff] }
  0x24   : > { %s216_s5 = scalar_lea.hbm %s716_s2, %s325_s24  ;;  %s218_s8 = sshll.u32 %s199_s7, 4  ;;  %v202_v2 = vadd.f32 %v201_v1, %v200_v0  ;;  %s219_s8 = int_to_ptr.vmem [resolvable:$true] %s218_s8 }
  0x25   : > { %s220_s15 = sshll.u32 %s216_s5, 4  ;;  %s205_s19 = scalar_lea.sflag [#allocation4], %s664_s25  ;;  %s221_s15 = int_to_ptr.hbm [resolvable:$true] %s220_s15 }
  0x26   : > { %203 = vst [vmem:[%s199_s7] sm:$0xff] %v202_v2  ;;  %s475_s17 = sshra.s32 %s221_s15, 4  ;;  %s481_s22 = scalar_lea.hbm %s716_s2, 16  ;;  %s476_s17 = int_to_ptr.hbm [resolvable:$true] %s475_s17 }
  0x27   : > { %s477_s16 = scalar_lea.hbm %s476_s17, 8  ;;  %p482_p11 = scmp.lt.s32.totalorder %s476_s17, %s716_s2 }
  0x28   : > { %p478_p1 = scmp.ne.s32.totalorder %s476_s17, %s477_s16  ;;  %p483_p12 = scmp.lt.s32.totalorder %s481_s22, %s477_s16 }
  0x2a   : > { %p479_p4 = pnand %p478_p1, %p644_p5  ;;  %p484_p13 = por %p483_p12, %p482_p11 }
  0x2c   : > { %p480_p8 = pneg %p479_p4 }
  0x2e   : > { %p485_p0 = pnand %p484_p13, %p480_p8 }
  0x30   : > { %488 = shalt.err (!%p485_p0)
}
  0x31   : > { %334 = dma.vmem_to_hbm [thread:$0]  (%p644_p5), %s219_s8, 128, %s221_s15, %s205_s19  }
  0x32 PF: > { %s232_s25 = sand.u32 1, %s527_s9   ;;  %p345_p3 = pnand %p317_p9, %p614_p6 }
  0x33   : > { %s233_s26 = scalar_lea.sflag [#allocation4], %s232_s25 }
  0x34   : > { %p346_p7 = pneg %p345_p3 }
  0x36   : > { %522 = dma.done.wait (%p346_p7), %s233_s26, 128  }
  0x37   : > { %524 = vsyncadd (%p346_p7), %s233_s26, 4294967168  ;;  %s19_s14 = sadd.s32 1, %s547_s14   ;;  %s724_s9 = smov %s531_s10 }
  0x38   : > { %p16_p10 = scmp.ge.s32.totalorder %s19_s14, 4   ;;  %s725_s10 = smov %s535_s11 }
  0x39   : > { %s726_s11 = smov %s653_s6  ;;  %s727_s12 = smov %s543_s13 }
  0x3a   : > { %s728_s13 = smov %s730_s27  ;;  %18 = sbr.rel (!%p16_p10) target bundleno = 7 (0x7), region = 78 }
  0x3f   :  { %239 = vsyncpa [#allocation3], 1 }
  0x40   :  { %241 = vsyncpa [#allocation3 + $0x1], 1 }
  0x41   :  { %242 = vsyncpa [#allocation6], 1 }
  0x42   :  { %243 = vsyncpa [#allocation4], 1 }
  0x43   :  { %245 = vsyncpa [#allocation4 + $0x1], 1 }

</bundles_post_ra>
